<compile_context>
chip_gen: v6e
topology: v6e:2x2x1
jax: 0.10.0
libtpu: 0.0.40
codegen_flags: <defaults>
</compile_context>

<pallas_src>
import jax
import jax.numpy as jnp
import numpy as np
from jax import lax
from jax.experimental import pallas as pl
from jax.experimental.pallas import tpu as pltpu

_BIG = 1e30  # Python float -> inlined literal (no captured jax constants)


def chamfer_kernel(bins_ref, pts_ref, out_ref, min_x_ref, sum_y_ref, cnt_ref):
    """One grid step = (batch element b, point tile p).

    bins_ref  : (NB, 1)   f32 bin centers (sublane column)
    pts_ref   : (1, PT)   f32 flattened target points (lane row, zero-padded)
    out_ref   : (1, 128)  f32 per-batch loss broadcast over lanes (VMEM)
    min_x_ref : (NB, 128) f32 running min-over-valid-points of (bin - pt)^2
    sum_y_ref : (1, 128)  f32 running masked sum of min-over-bins
    cnt_ref   : (1, 128)  f32 running valid-point count
    """
    p = pl.program_id(1)
    nb = bins_ref.shape[0]
    n_chunks = pts_ref.shape[1] // 128

    @pl.when(p == 0)
    def _init():
        min_x_ref[...] = jnp.full(min_x_ref.shape, _BIG, dtype=jnp.float32)
        sum_y_ref[...] = jnp.zeros(sum_y_ref.shape, dtype=jnp.float32)
        cnt_ref[...] = jnp.zeros(cnt_ref.shape, dtype=jnp.float32)

    # Hoisted once per grid step (JAX does not CSE broadcast_in_dim).
    bins_b = jnp.broadcast_to(bins_ref[...], (nb, 128))             # (NB, 128)

    def body(k, carry):
        acc, sy, cn = carry
        off = pl.multiple_of(k * 128, 128)
        prow = pts_ref[:, pl.ds(off, 128)]                          # (1, 128)
        mk = prow >= 0.01                                           # (1, 128)
        dk = (bins_b - prow) ** 2                                   # (NB, 128)
        # cham_x: running min over valid points (distances masked like ref).
        acc = jnp.minimum(acc, jnp.where(mk, dk, _BIG))
        # cham_y: nearest bin per point, summed over valid points.
        mob = jnp.min(dk, axis=0, keepdims=True)                    # (1, 128)
        sy = sy + jnp.where(mk, mob, 0.0)
        cn = cn + mk.astype(jnp.float32)
        return acc, sy, cn

    acc, sy, cn = lax.fori_loop(
        0, n_chunks, body,
        (min_x_ref[...], sum_y_ref[...], cnt_ref[...]),
        unroll=min(4, n_chunks))

    min_x_ref[...] = acc
    sum_y_ref[...] = sy
    cnt_ref[...] = cn

    @pl.when(p == pl.num_programs(1) - 1)
    def _finalize():
        # cham_x: mean over bins of (min over all valid points).
        min_per_bin = jnp.min(min_x_ref[...], axis=1, keepdims=True)       # (NB,1)
        cham_x = jnp.sum(min_per_bin, axis=0, keepdims=True) / float(nb)   # (1,1)
        # cham_y: mean over valid points of (min over bins).  0/0 -> NaN if a
        # batch element has no valid points (matches reference semantics).
        y_len = jnp.sum(cnt_ref[...], axis=1, keepdims=True)               # (1,1)
        sum_y = jnp.sum(sum_y_ref[...], axis=1, keepdims=True)             # (1,1)
        total = cham_x + sum_y / y_len                                     # (1,1)
        out_ref[...] = jnp.broadcast_to(total, out_ref.shape)


def bins_chamfer_loss(bin_centers, target, p_tile=32768):
    """Pallas equivalent of BinsChamferLoss.forward (batch_reduction='mean')."""
    if bin_centers.ndim == 1:
        bin_centers = bin_centers[None, :]
    bin_centers = bin_centers.astype(jnp.float32)
    B, NB = bin_centers.shape

    pts = target.reshape(B, -1).astype(jnp.float32)                # flatten(1)
    P = pts.shape[1]

    # Lane-aligned tile (multiple of 128), capped at the 128-rounded P.
    pt = ((max(int(p_tile), 128) + 127) // 128) * 128
    p_ru = ((P + 127) // 128) * 128
    pt = min(pt, p_ru)
    P_pad = ((P + pt - 1) // pt) * pt
    if P_pad != P:
        # zero padding < 0.01 -> masked out of both chamfer directions
        pts = jnp.pad(pts, ((0, 0), (0, P_pad - P)))
    num_p = P_pad // pt

    bins3 = bin_centers[:, :, None]                                # (B, NB, 1)
    pts3 = pts[:, None, :]                                         # (B, 1, P_pad)

    # NOTE(v7x): only the batch axis is "parallel"; for B == 1 on a 2-TC chip
    # the point axis could additionally be split into a leading parallel axis
    # with partials combined in the wrapper.
    out = pl.pallas_call(
        chamfer_kernel,
        out_shape=jax.ShapeDtypeStruct((B, 1, 128), jnp.float32),
        grid_spec=pltpu.PrefetchScalarGridSpec(
            num_scalar_prefetch=0,
            grid=(B, num_p),
            in_specs=[
                pl.BlockSpec((None, NB, 1), lambda b, p: (b, 0, 0)),   # bins
                pl.BlockSpec((None, 1, pt), lambda b, p: (b, 0, p)),   # points
            ],
            out_specs=pl.BlockSpec((None, 1, 128), lambda b, p: (b, 0, 0)),
            scratch_shapes=[
                pltpu.VMEM((NB, 128), jnp.float32),   # running min_x
                pltpu.VMEM((1, 128), jnp.float32),    # running cham_y sum
                pltpu.VMEM((1, 128), jnp.float32),    # running valid count
            ],
        ),
        compiler_params=pltpu.CompilerParams(
            dimension_semantics=("parallel", "arbitrary"),
            vmem_limit_bytes=32 << 20),
    )(bins3, pts3)

    per_batch = out[:, 0, 0]                                       # (B,)
    return jnp.sum(per_batch) / jnp.float32(B)                     # batch mean


def reference_loss(bin_centers, target):
    """Pure-JAX reference reproducing pytorch3d chamfer_distance semantics."""
    if bin_centers.ndim == 1:
        bin_centers = bin_centers[None, :]
    bin_centers = bin_centers.astype(jnp.float32)
    B, NB = bin_centers.shape
    pts = target.reshape(B, -1).astype(jnp.float32)
    mask = pts >= 0.01
    y_len = mask.sum(axis=1).astype(jnp.float32)
    d = (bin_centers[:, :, None] - pts[:, None, :]) ** 2           # (B, NB, P)
    d_x = jnp.where(mask[:, None, :], d, 1e30)
    cham_x = jnp.min(d_x, axis=2).sum(axis=1) / NB                 # (B,)
    min_over_x = jnp.min(d, axis=1)                                # (B, P)
    cham_y = jnp.where(mask, min_over_x, 0.0).sum(axis=1) / y_len
    return (cham_x.sum() + cham_y.sum()) / B


if __name__ == "__main__":
    key = jax.random.PRNGKey(0)
    k1, k2 = jax.random.split(key)

    B, NB = 2, 16
    C, H, W = 1, 16, 16

    # Deterministic inputs; some target values fall below 0.01 to exercise
    # masking (they are excluded from both chamfer directions).
    bin_centers = jax.random.uniform(k1, (B, NB), dtype=jnp.float32,
                                     minval=0.0, maxval=1.0)
    target = jax.random.uniform(k2, (B, C, H, W), dtype=jnp.float32,
                                minval=-0.2, maxval=1.0)

    loss = jax.block_until_ready(bins_chamfer_loss(bin_centers, target))
    ref = jax.block_until_ready(reference_loss(bin_centers, target))

    np.testing.assert_allclose(np.asarray(loss), np.asarray(ref),
                               rtol=1e-4, atol=1e-6)
    print("KERNEL_OK")
</pallas_src>

<mosaic_0001>
module attributes {stable_mosaic.version = 11 : i64} {
  func.func @chamfer_kernel(%arg0: i32, %arg1: i32, %arg2: memref<1x16x1xf32, #tpu.memory_space<vmem>>, %arg3: memref<1x1x256xf32, #tpu.memory_space<vmem>>, %arg4: memref<1x1x128xf32, #tpu.memory_space<vmem>>, %arg5: memref<16x128xf32, #tpu.memory_space<vmem>>, %arg6: memref<1x128xf32, #tpu.memory_space<vmem>>, %arg7: memref<1x128xf32, #tpu.memory_space<vmem>>) attributes {dimension_semantics = [#tpu.dimension_semantics<parallel>, #tpu.dimension_semantics<arbitrary>], iteration_bounds = array<i64: 2, 1>, scalar_prefetch = 0 : i64, scratch_operands = 3 : i64, tpu.core_type = #tpu.core_type<tc>, window_params = [{transform_indices = @transform_0, window_bounds = array<i64: 1, 16, 1>}, {transform_indices = @transform_1, window_bounds = array<i64: 1, 1, 256>}, {transform_indices = @transform_2, window_bounds = array<i64: 1, 1, 128>}]} {
    %c0_i32 = arith.constant 0 : i32
    %0 = arith.cmpi eq, %arg1, %c0_i32 : i32
    %1 = arith.extui %0 : i1 to i32
    %c0_i32_0 = arith.constant 0 : i32
    %2 = arith.cmpi ne, %1, %c0_i32_0 : i32
    scf.if %2 {
      %cst_30 = arith.constant 1.000000e+30 : f32
      %62 = vector.broadcast %cst_30 : f32 to vector<16x128xf32>
      %c0_31 = arith.constant 0 : index
      %c0_32 = arith.constant 0 : index
      %63 = vector.load %arg5[%c0_31, %c0_32] : memref<16x128xf32, #tpu.memory_space<vmem>>, vector<16x128xf32>
      tpu.vector_store %arg5[%c0_31, %c0_32], %62 {strides = array<i32>} : memref<16x128xf32, #tpu.memory_space<vmem>>, vector<16x128xf32>,
      %cst_33 = arith.constant 0.000000e+00 : f32
      %64 = vector.broadcast %cst_33 : f32 to vector<1x128xf32>
      %c0_34 = arith.constant 0 : index
      %c0_35 = arith.constant 0 : index
      %65 = vector.load %arg6[%c0_34, %c0_35] : memref<1x128xf32, #tpu.memory_space<vmem>>, vector<1x128xf32>
      tpu.vector_store %arg6[%c0_34, %c0_35], %64 {strides = array<i32>} : memref<1x128xf32, #tpu.memory_space<vmem>>, vector<1x128xf32>,
      %cst_36 = arith.constant 0.000000e+00 : f32
      %66 = vector.broadcast %cst_36 : f32 to vector<1x128xf32>
      %c0_37 = arith.constant 0 : index
      %c0_38 = arith.constant 0 : index
      %67 = vector.load %arg7[%c0_37, %c0_38] : memref<1x128xf32, #tpu.memory_space<vmem>>, vector<1x128xf32>
      tpu.vector_store %arg7[%c0_37, %c0_38], %66 {strides = array<i32>} : memref<1x128xf32, #tpu.memory_space<vmem>>, vector<1x128xf32>,
    } else {
    }
    %c0 = arith.constant 0 : index
    %c0_1 = arith.constant 0 : index
    %c0_2 = arith.constant 0 : index
    %3 = vector.load %arg2[%c0, %c0_1, %c0_2] : memref<1x16x1xf32, #tpu.memory_space<vmem>>, vector<1x16x1xf32>
    %4 = vector.shape_cast %3 : vector<1x16x1xf32> to vector<16x1xf32>
    %5 = vector.shape_cast %4 : vector<16x1xf32> to vector<16x1xf32>
    %6 = vector.broadcast %5 : vector<16x1xf32> to vector<16x128xf32>
    %c0_3 = arith.constant 0 : index
    %c0_4 = arith.constant 0 : index
    %7 = vector.load %arg5[%c0_3, %c0_4] : memref<16x128xf32, #tpu.memory_space<vmem>>, vector<16x128xf32>
    %c0_5 = arith.constant 0 : index
    %c0_6 = arith.constant 0 : index
    %8 = vector.load %arg6[%c0_5, %c0_6] : memref<1x128xf32, #tpu.memory_space<vmem>>, vector<1x128xf32>
    %c0_7 = arith.constant 0 : index
    %c0_8 = arith.constant 0 : index
    %9 = vector.load %arg7[%c0_7, %c0_8] : memref<1x128xf32, #tpu.memory_space<vmem>>, vector<1x128xf32>
    %c0_i32_9 = arith.constant 0 : i32
    %c128_i32 = arith.constant 128 : i32
    %10 = arith.muli %c0_i32_9, %c128_i32 : i32
    %11 = tpu.assume_multiple %10, 128 : i32
    %c0_10 = arith.constant 0 : index
    %c0_11 = arith.constant 0 : index
    %12 = arith.index_cast %11 : i32 to index
    %13 = vector.load %arg3[%c0_10, %c0_11, %12] : memref<1x1x256xf32, #tpu.memory_space<vmem>>, vector<1x1x128xf32>
    %14 = vector.shape_cast %13 : vector<1x1x128xf32> to vector<1x128xf32>
    %cst = arith.constant 0.00999999977 : f32
    %15 = vector.broadcast %cst : f32 to vector<1x128xf32>
    %16 = arith.cmpf oge, %14, %15 : vector<1x128xf32>
    %17 = vector.broadcast %14 : vector<1x128xf32> to vector<16x128xf32>
    %18 = arith.subf %6, %17 : vector<16x128xf32>
    %19 = arith.mulf %18, %18 : vector<16x128xf32>
    %cst_12 = arith.constant 1.000000e+30 : f32
    %20 = vector.shape_cast %16 : vector<1x128xi1> to vector<1x128xi1>
    %21 = vector.broadcast %20 : vector<1x128xi1> to vector<16x128xi1>
    %22 = vector.broadcast %cst_12 : f32 to vector<16x128xf32>
    %23 = arith.select %21, %19, %22 : vector<16x128xi1>, vector<16x128xf32>
    %24 = arith.minimumf %7, %23 : vector<16x128xf32>
    %cst_13 = arith.constant dense<0x7F800000> : vector<128xf32>
    %25 = vector.multi_reduction <minimumf>, %19, %cst_13 [0] : vector<16x128xf32> to vector<128xf32>
    %26 = vector.shape_cast %25 : vector<128xf32> to vector<1x128xf32>
    %cst_14 = arith.constant 0.000000e+00 : f32
    %27 = vector.broadcast %cst_14 : f32 to vector<1x128xf32>
    %28 = arith.select %16, %26, %27 : vector<1x128xi1>, vector<1x128xf32>
    %29 = arith.addf %8, %28 : vector<1x128xf32>
    %30 = arith.extui %16 : vector<1x128xi1> to vector<1x128xi32>
    %31 = arith.sitofp %30 : vector<1x128xi32> to vector<1x128xf32>
    %32 = arith.addf %9, %31 : vector<1x128xf32>
    %c1_i32 = arith.constant 1 : i32
    %c128_i32_15 = arith.constant 128 : i32
    %33 = arith.muli %c1_i32, %c128_i32_15 : i32
    %34 = tpu.assume_multiple %33, 128 : i32
    %c0_16 = arith.constant 0 : index
    %c0_17 = arith.constant 0 : index
    %35 = arith.index_cast %34 : i32 to index
    %36 = vector.load %arg3[%c0_16, %c0_17, %35] : memref<1x1x256xf32, #tpu.memory_space<vmem>>, vector<1x1x128xf32>
    %37 = vector.shape_cast %36 : vector<1x1x128xf32> to vector<1x128xf32>
    %cst_18 = arith.constant 0.00999999977 : f32
    %38 = vector.broadcast %cst_18 : f32 to vector<1x128xf32>
    %39 = arith.cmpf oge, %37, %38 : vector<1x128xf32>
    %40 = vector.broadcast %37 : vector<1x128xf32> to vector<16x128xf32>
    %41 = arith.subf %6, %40 : vector<16x128xf32>
    %42 = arith.mulf %41, %41 : vector<16x128xf32>
    %cst_19 = arith.constant 1.000000e+30 : f32
    %43 = vector.shape_cast %39 : vector<1x128xi1> to vector<1x128xi1>
    %44 = vector.broadcast %43 : vector<1x128xi1> to vector<16x128xi1>
    %45 = vector.broadcast %cst_19 : f32 to vector<16x128xf32>
    %46 = arith.select %44, %42, %45 : vector<16x128xi1>, vector<16x128xf32>
    %47 = arith.minimumf %24, %46 : vector<16x128xf32>
    %cst_20 = arith.constant dense<0x7F800000> : vector<128xf32>
    %48 = vector.multi_reduction <minimumf>, %42, %cst_20 [0] : vector<16x128xf32> to vector<128xf32>
    %49 = vector.shape_cast %48 : vector<128xf32> to vector<1x128xf32>
    %cst_21 = arith.constant 0.000000e+00 : f32
    %50 = vector.broadcast %cst_21 : f32 to vector<1x128xf32>
    %51 = arith.select %39, %49, %50 : vector<1x128xi1>, vector<1x128xf32>
    %52 = arith.addf %29, %51 : vector<1x128xf32>
    %53 = arith.extui %39 : vector<1x128xi1> to vector<1x128xi32>
    %54 = arith.sitofp %53 : vector<1x128xi32> to vector<1x128xf32>
    %55 = arith.addf %32, %54 : vector<1x128xf32>
    %c2_i32 = arith.constant 2 : i32
    %c0_22 = arith.constant 0 : index
    %c0_23 = arith.constant 0 : index
    %56 = vector.load %arg5[%c0_22, %c0_23] : memref<16x128xf32, #tpu.memory_space<vmem>>, vector<16x128xf32>
    tpu.vector_store %arg5[%c0_22, %c0_23], %47 {strides = array<i32>} : memref<16x128xf32, #tpu.memory_space<vmem>>, vector<16x128xf32>,
    %c0_24 = arith.constant 0 : index
    %c0_25 = arith.constant 0 : index
    %57 = vector.load %arg6[%c0_24, %c0_25] : memref<1x128xf32, #tpu.memory_space<vmem>>, vector<1x128xf32>
    tpu.vector_store %arg6[%c0_24, %c0_25], %52 {strides = array<i32>} : memref<1x128xf32, #tpu.memory_space<vmem>>, vector<1x128xf32>,
    %c0_26 = arith.constant 0 : index
    %c0_27 = arith.constant 0 : index
    %58 = vector.load %arg7[%c0_26, %c0_27] : memref<1x128xf32, #tpu.memory_space<vmem>>, vector<1x128xf32>
    tpu.vector_store %arg7[%c0_26, %c0_27], %55 {strides = array<i32>} : memref<1x128xf32, #tpu.memory_space<vmem>>, vector<1x128xf32>,
    %c0_i32_28 = arith.constant 0 : i32
    %59 = arith.cmpi eq, %arg1, %c0_i32_28 : i32
    %60 = arith.extui %59 : i1 to i32
    %c0_i32_29 = arith.constant 0 : i32
    %61 = arith.cmpi ne, %60, %c0_i32_29 : i32
    scf.if %61 {
      %c0_30 = arith.constant 0 : index
      %c0_31 = arith.constant 0 : index
      %62 = vector.load %arg5[%c0_30, %c0_31] : memref<16x128xf32, #tpu.memory_space<vmem>>, vector<16x128xf32>
      %cst_32 = arith.constant dense<0x7F800000> : vector<16xf32>
      %63 = vector.multi_reduction <minimumf>, %62, %cst_32 [1] : vector<16x128xf32> to vector<16xf32>
      %64 = vector.shape_cast %63 : vector<16xf32> to vector<16x1xf32>
      %cst_33 = arith.constant dense<0.000000e+00> : vector<1xf32>
      %65 = vector.multi_reduction <add>, %64, %cst_33 [0] : vector<16x1xf32> to vector<1xf32>
      %66 = vector.shape_cast %65 : vector<1xf32> to vector<1x1xf32>
      %cst_34 = arith.constant 1.600000e+01 : f32
      %67 = vector.broadcast %cst_34 : f32 to vector<1x1xf32>
      %68 = arith.divf %66, %67 : vector<1x1xf32>
      %c0_35 = arith.constant 0 : index
      %c0_36 = arith.constant 0 : index
      %69 = vector.load %arg7[%c0_35, %c0_36] : memref<1x128xf32, #tpu.memory_space<vmem>>, vector<1x128xf32>
      %cst_37 = arith.constant dense<0.000000e+00> : vector<1xf32>
      %70 = vector.multi_reduction <add>, %69, %cst_37 [1] : vector<1x128xf32> to vector<1xf32>
      %71 = vector.shape_cast %70 : vector<1xf32> to vector<1x1xf32>
      %c0_38 = arith.constant 0 : index
      %c0_39 = arith.constant 0 : index
      %72 = vector.load %arg6[%c0_38, %c0_39] : memref<1x128xf32, #tpu.memory_space<vmem>>, vector<1x128xf32>
      %cst_40 = arith.constant dense<0.000000e+00> : vector<1xf32>
      %73 = vector.multi_reduction <add>, %72, %cst_40 [1] : vector<1x128xf32> to vector<1xf32>
      %74 = vector.shape_cast %73 : vector<1xf32> to vector<1x1xf32>
      %75 = arith.divf %74, %71 : vector<1x1xf32>
      %76 = arith.addf %68, %75 : vector<1x1xf32>
      %77 = vector.shape_cast %76 : vector<1x1xf32> to vector<1x1xf32>
      %78 = vector.broadcast %77 : vector<1x1xf32> to vector<1x128xf32>
      %c0_41 = arith.constant 0 : index
      %c0_42 = arith.constant 0 : index
      %c0_43 = arith.constant 0 : index
      %79 = vector.load %arg4[%c0_41, %c0_42, %c0_43] : memref<1x1x128xf32, #tpu.memory_space<vmem>>, vector<1x1x128xf32>
      %80 = vector.shape_cast %79 : vector<1x1x128xf32> to vector<1x128xf32>
      %81 = vector.shape_cast %78 : vector<1x128xf32> to vector<1x1x128xf32>
      tpu.vector_store %arg4[%c0_41, %c0_42, %c0_43], %81 {strides = array<i32>} : memref<1x1x128xf32, #tpu.memory_space<vmem>>, vector<1x1x128xf32>,
    } else {
    }
    return
  }
  func.func @transform_0(%arg0: i32, %arg1: i32) -> (i32, i32, i32) {
    %c0_i32 = arith.constant 0 : i32
    %c0_i32_0 = arith.constant 0 : i32
    %c0_i32_1 = arith.constant 0 : i32
    return %arg0, %c0_i32, %c0_i32_0 : i32, i32, i32
  }
  func.func @transform_1(%arg0: i32, %arg1: i32) -> (i32, i32, i32) {
    %c0_i32 = arith.constant 0 : i32
    %c0_i32_0 = arith.constant 0 : i32
    return %arg0, %c0_i32, %arg1 : i32, i32, i32
  }
  func.func @transform_2(%arg0: i32, %arg1: i32) -> (i32, i32, i32) {
    %c0_i32 = arith.constant 0 : i32
    %c0_i32_0 = arith.constant 0 : i32
    %c0_i32_1 = arith.constant 0 : i32
    return %arg0, %c0_i32, %c0_i32_0 : i32, i32, i32
  }
}

</mosaic_0001>

<bundles_post_ra>
// kernel: tpu_custom_call.1
= control target key start
LH: loop header
LB: loop body
LE: loop exit
PB: predicated region body
PF: predicated region fallthrough
CT: control target
= control target key end

     0   :  { %7 = vsyncpa [#allocation6], 0  ;;  %s707_s0 = inlined_call_operand.vmem [shape: f32[2,16,1], index: 0, kind: input, shape index: {}]   ;;  %s708_s1 = inlined_call_operand.vmem [shape: f32[2,1,256], index: 1, kind: input, shape index: {}]   ;;  %s709_s2 = inlined_call_operand.hbm [shape: f32[2,1,128], index: 2, kind: output, shape index: {}]  }
   0x1   :  { %9 = vsyncpa [#allocation6 + $0x1], 0  ;;  %s574_s9 = smov 0   ;;  %s576_s10 = smov 0  }
   0x2   :  { %s578_s11 = smov 0   ;;  %s580_s12 = smov 0  }
   0x3   :  { %s582_s13 = smov 0   ;;  %s584_s14 = smov 0  }
   0x4 LB: > { %s403_s15 = sadd.s32 4294967295, %s554_s14   ;;  %s404_s16 = sadd.s32 4294967294, %s554_s14   ;;  %s554_s14 = sphi %s584_s14, %s15_s14   ;;  %s550_s13 = sphi %s582_s13, %s720_s13   ;;  %s546_s12 = sphi %s580_s12, %s719_s12   ;;  %s542_s11 = sphi %s578_s11, %s718_s11   ;;  %s538_s10 = sphi %s576_s10, %s717_s10   ;;  %s534_s9 = sphi %s574_s9, %s716_s9  }
   0x5   : > { %s27_s17 = sadd.s32 1, %s550_s13  ;;  %s88_s18 = sadd.s32 1, %s542_s11 }
   0x6   : > { %p29_p0 = scmp.ge.s32.totalorder %s27_s17, 2  ;;  %p98_p1 = scmp.ne.s32.totalorder %s542_s11, %s538_s10 }
   0x7   : > { %p99_p2 = scmp.eq.s32.totalorder %s403_s15, 1  ;;  %p104_p3 = scmp.ne.s32.totalorder %s538_s10, %s534_s9 }
   0x8   : > { %s722_s17 = smov (%p29_p0, %s27_s17), 0  ;;  %p105_p5 = scmp.eq.s32.totalorder %s404_s16, 1 }
   0x9   : > { %p614_p4 = por %p99_p2, %p98_p1  ;;  %s85_s20 = ssub.s32 %s550_s13, %s722_s17 }
   0xa   : > { %p407_p6 = scmp.ge.s32.totalorder %s554_s14, 1  ;;  %p86_p7 = scmp.eq.s32.totalorder %s85_s20, 0 }
   0xb   : > { %p621_p8 = por %p105_p5, %p104_p3  ;;  %p143_p9 = scmp.lt.s32.totalorder %s554_s14, 3 }
   0xc   : > { %s627_s22 = scalar_select %p86_p7, %s542_s11, %s88_s18  }
   0xd   : > { %p144_p10 = pnand %p407_p6, %p143_p9 }
   0xe   : > { %p172_p11 = scmp.lt.s32.totalorder (!%p144_p10), %s546_s12, 1  ;;  %s170_s4 = sand.u32 (!%p144_p10), 1, %s538_s10  }
   0xf   : > { %147 = sbr.rel (%p144_p10) target bundleno = 340 (0x154), region = 28  ;;  %s414_s5 = sshll.u32 (!%p144_p10), %s546_s12, 4 }
  0x10   : > { %s171_s6 = scalar_lea.vmem (!%p144_p10), [#allocation5], %s170_s4  ;;  %s323_s16 = scalar_lea.hbm (!%p144_p10), %s709_s2, %s414_s5 }
  0x11   : > { %s325_s7 = sshll.u32 (!%p144_p10), %s171_s6, 4  ;;  %s313_s18 = scalar_lea.sflag (!%p144_p10), [#allocation6], %s170_s4  ;;  %s326_s7 = int_to_ptr.vmem [resolvable:$true] %s325_s7 }
  0x12   : > { %s478_s20 = scalar_lea.vmem (!%p144_p10), %s326_s7, 16 }
  0x13   : > { %p479_p12 = scmp.ne.s32.totalorder (!%p144_p10), %s326_s7, %s478_s20 }
  0x14   : > { %v556_v0 = vmov 0   ;;  %v557_v1 = vmov 0.0   ;;  %s173_s23 = scalar_select %p172_p11, %s546_s12, 1  ;;  %vm300_vm2 = vcmask 1040384   ;;  %v213_v13 = vlaneseq }
  0x15   : > { %475 = vset.pattern.permute.xlu0 %v556_v0  ;;  %193 = vst [vmem:[#allocation4] sm:$0x1] %v557_v1  ;;  %192 = vst [vmem:[#allocation3] sm:$0x1] %v557_v1  ;;  %p480_p13 = pnand %p479_p12, %p614_p4 }
  0x16   : > { %s417_s24 = sshll.u32 %s173_s23, 4  ;;  %s410_s25 = sshll.u32 %s173_s23, 1  ;;  %v214_v14 = vshrl.u32 %v213_v13, 7 }
  0x17   : > { %s176_s28 = scalar_lea.vmem %s707_s0, %s417_s24  ;;  %s184_s3 = scalar_lea.vmem %s708_s1, %s410_s25 }
  0x18   : > { %v194_v2 = vld [vmem:[%s176_s28] sm:$0xff]  ;;  %v195_v4 = vld [vmem:[%s176_s28 + $0x8] sm:$0xff]  ;;  %v215_v15 = vsub.s32 0, %v214_v14  ;;  %p481_p0 = pneg %p480_p13  ;;  %s558_s23 = smov [#allocation5]  }
  0x19   : > { %v637_v3 = vld [vmem:[%s184_s3] sm:$0x1]  ;;  %198 = vperm.xlu0 %475, %v194_v2   ;;  %v412_v7 = vld [vmem:[%s184_s3 + $0x1] sm:$0x1]  ;;  %s482_s24 = sshll.u32 %s558_s23, 4  ;;  %s483_s24 = int_to_ptr.vmem [resolvable:$false] %s482_s24 }
  0x1a   : > { %vm211_vm0 = vcmp.ge.f32.partialorder %v637_v3, 0.01  ;;  %vm245_vm1 = vcmp.ge.f32.partialorder %v412_v7, 0.01  ;;  %v216_v18 = vrot.slane %v637_v3, %v215_v15  ;;  %v250_v19 = vrot.slane %v412_v7, %v215_v15  ;;  %s484_s12 = scalar_lea.vmem %s483_s24, 32  ;;  %p485_p1 = scmp.lt.s32.totalorder %s326_s7, %s483_s24 }
  0x1b   : > { %v411_v6 = vsel %vm211_vm0, 1.0, %v557_v1  ;;  %v413_v9 = vsel %vm245_vm1, 1.0, %v557_v1  ;;  %v222_v16 = vsel %vm211_vm0, 1, %v556_v0  ;;  %v256_v17 = vsel %vm245_vm1, 1, %v556_v0  ;;  %p486_p2 = scmp.lt.s32.totalorder %s484_s12, %s478_s20 }
  0x1c   : > { %v209_v5 = vld [vmem:[#allocation4] sm:$0x1]  ;;  %v226_v20 = vrot.slane %v222_v16, %v215_v15  ;;  %v260_v21 = vrot.slane %v256_v17, %v215_v15  ;;  %v208_v55 = vld [vmem:[#allocation3] sm:$0x1] }
  0x1d   : > { %v242_v8 = vadd.f32 %v411_v6, %v209_v5  ;;  %203 = vperm.xlu0 %475, %v195_v4   ;;  %p487_p3 = por %p486_p2, %p485_p1 }
  0x1e   : > { %vm648_vm3 = vcmp.eq.s32.totalorder %v226_v20, 1  ;;  %vm652_vm4 = vcmp.eq.s32.totalorder %v260_v21, 1 }
  0x1f   : > { %v276_v10 = vadd.f32 %v413_v9, %v242_v8  ;;  %p488_p5 = pnand %p487_p3, %p481_p0 }
  0x21   : > { %280 = vst [vmem:[#allocation4] sm:$0x1] %v276_v10 }
  0x28   : > { %v299_v11 = vld [vmem:[#allocation4] sm:$0x1] }
  0x29   : > { %v301_v12 = vsel %vm300_vm2, %v299_v11, 0.0 }
  0x3c   : > { %302 = vadd.xlane.f32.xlu0 %v301_v12 }
  0x94   : > { %v199_v22 = vpop.permute.xlu0 %198 }
  0x95   : > { %v218_v23 = vsub.f32 %v199_v22, %v216_v18  ;;  %v252_v24 = vsub.f32 %v199_v22, %v250_v19 }
  0x97   : > { %v220_v27 = vmul.f32 %v218_v23, %v218_v23  ;;  %v254_v28 = vmul.f32 %v252_v24, %v252_v24 }
  0x98   : > { %v204_v29 = vpop.permute.xlu0 %203 }
  0x99   : > { %v219_v30 = vsub.f32 %v204_v29, %v216_v18  ;;  %v253_v31 = vsub.f32 %v204_v29, %v250_v19  ;;  %v228_v32 = vsel %vm648_vm3, %v220_v27, 1e+30  ;;  %v262_v33 = vsel %vm652_vm4, %v254_v28, 1e+30 }
  0x9a   : > { %v230_v34 = vmin.f32 %v228_v32, 1e+30 }
  0x9b   : > { %v221_v35 = vmul.f32 %v219_v30, %v219_v30  ;;  %v255_v36 = vmul.f32 %v253_v31, %v253_v31 }
  0x9c   : > { %v264_v37 = vmin.f32 %v230_v34, %v262_v33 }
  0x9d   : > { %v232_v38 = vmin.f32 %v220_v27, %v221_v35  ;;  %v266_v39 = vmin.f32 %v254_v28, %v255_v36  ;;  %v229_v40 = vsel %vm648_vm3, %v221_v35, 1e+30  ;;  %v263_v41 = vsel %vm652_vm4, %v255_v36, 1e+30 }
  0x9e   : > { %286 = vmin.xlane.f32.xlu1 %v264_v37  ;;  %v231_v42 = vmin.f32 %v229_v40, 1e+30 }
  0x9f   : > { %v233_v43 = vrot.slane %v232_v38, 4  ;;  %v267_v44 = vrot.slane %v266_v39, 4 }
  0xa0   : > { %v265_v45 = vmin.f32 %v231_v42, %v263_v41 }
  0xa1   : > { %v234_v46 = vmin.f32 %v232_v38, %v233_v43  ;;  %v268_v47 = vmin.f32 %v266_v39, %v267_v44 }
  0xa2   : > { %288 = vmin.xlane.f32.xlu1 %v265_v45 }
  0xa3   : > { %v235_v48 = vrot.slane %v234_v46, 2  ;;  %v269_v49 = vrot.slane %v268_v47, 2 }
  0xa5   : > { %v236_v50 = vmin.f32 %v234_v46, %v235_v48  ;;  %v270_v51 = vmin.f32 %v268_v47, %v269_v49 }
  0xa7   : > { %v237_v52 = vrot.slane %v236_v50, 1  ;;  %v271_v53 = vrot.slane %v270_v51, 1 }
  0xa9   : > { %v238_v54 = vmin.f32 %v236_v50, %v237_v52  ;;  %v272_v56 = vmin.f32 %v270_v51, %v271_v53 }
  0xab   : > { %v239_v57 = vsel %vm211_vm0, %v238_v54, 0.0  ;;  %v273_v59 = vsel %vm245_vm1, %v272_v56, 0.0 }
  0xac   : > { %v240_v58 = vadd.f32 %v239_v57, %v208_v55 }
  0xae   : > { %v274_v60 = vadd.f32 %v273_v59, %v240_v58 }
  0xb0   : > { %279 = vst [vmem:[#allocation3] sm:$0x1] %v274_v60 }
  0xb7   : > { %v304_v61 = vld [vmem:[#allocation3] sm:$0x1] }
  0xb8   : > { %v305_v62 = vsel %vm300_vm2, %v304_v61, 0.0 }
  0xb9   : > { %306 = vadd.xlane.f32.xlu1 %v305_v62 }
  0xc5   : > { %v303_v5 = vpop.xlane.xlu0 %302 }
  0xc6   : > { %476 = vrcp.f32 %v303_v5 }
  0xd3   : > { %v477_v9 = vpop.eup %476 }
 0x127   : > { %v287_v63 = vpop.xlane.xlu1 %286 }
 0x12b   : > { %v289_v0 = vpop.xlane.xlu1 %288 }
 0x12c   : > { %v290_v1 = vadd.f32 %v289_v0, %v287_v63 }
 0x12e   : > { %v291_v2 = vrot.slane %v290_v1, 4 }
 0x130   : > { %v292_v4 = vadd.f32 %v291_v2, %v290_v1 }
 0x132   : > { %v293_v6 = vrot.slane %v292_v4, 2 }
 0x134   : > { %v294_v3 = vadd.f32 %v293_v6, %v292_v4 }
 0x136   : > { %v295_v8 = vrot.slane %v294_v3, 1 }
 0x138   : > { %v296_v7 = vadd.f32 %v295_v8, %v294_v3 }
 0x13a   : > { %v298_v11 = vmul.f32 0.0625, %v296_v7 }
 0x142   : > { %v307_v10 = vpop.xlane.xlu1 %306 }
 0x143   : > { %v309_v12 = vmul.f32 %v477_v9, %v307_v10 }
 0x145   : > { %v310_v13 = vadd.f32 %v309_v12, %v298_v11 }
 0x147   : > { %311 = vst [vmem:[%s171_s6] sm:$0x1] %v310_v13 }
 0x148   : > { %491 = shalt.err (!%p488_p5)
}
 0x149   : > { %s492_s25 = scalar_lea.hbm %s323_s16, 16  ;;  %s496_s28 = scalar_lea.hbm %s709_s2, 32 }
 0x14a   : > { %p493_p6 = scmp.ne.s32.totalorder %s323_s16, %s492_s25  ;;  %p497_p10 = scmp.lt.s32.totalorder %s323_s16, %s709_s2 }
 0x14b   : > { %p498_p11 = scmp.lt.s32.totalorder %s496_s28, %s492_s25 }
 0x14c   : > { %p494_p7 = pnand %p493_p6, %p614_p4 }
 0x14d   : > { %p499_p12 = por %p498_p11, %p497_p10 }
 0x14e   : > { %p495_p9 = pneg %p494_p7 }
 0x150   : > { %p500_p13 = pnand %p499_p12, %p495_p9 }
 0x152   : > { %503 = shalt.err (!%p500_p13)
}
 0x153   : > { %418 = dma.vmem_to_hbm [thread:$0]  (%p614_p4), %s326_s7, 16, %s323_s16, %s313_s18  }
 0x154 PF: > { %p424_p0 = scmp.ge.s32.totalorder %s554_s14, 2  ;;  %s337_s3 = sand.u32 1, %s534_s9  }
 0x155   : > { %s338_s4 = scalar_lea.sflag [#allocation6], %s337_s3 }
 0x156   : > { %p421_p1 = pnand %p424_p0, %p621_p8 }
 0x158   : > { %p422_p2 = pneg %p421_p1 }
 0x15a   : > { %529 = dma.done.wait (%p422_p2), %s338_s4, 16  }
 0x15b   : > { %531 = vsyncadd (%p422_p2), %s338_s4, 4294967280  ;;  %s15_s14 = sadd.s32 1, %s554_s14   ;;  %s716_s9 = smov %s538_s10 }
 0x15c   : > { %p12_p3 = scmp.ge.s32.totalorder %s15_s14, 4   ;;  %s717_s10 = smov %s542_s11 }
 0x15d   : > { %s718_s11 = smov %s627_s22  ;;  %s719_s12 = smov %s550_s13 }
 0x15e   : > { %s720_s13 = smov %s722_s17  ;;  %14 = sbr.rel (!%p12_p3) target bundleno = 4 (0x4), region = 75 }
 0x163   :  { %342 = vsyncpa [#allocation6], 1 }
 0x164   :  { %344 = vsyncpa [#allocation6 + $0x1], 1 }

</bundles_post_ra>
